<compile_context>
chip_gen: v7x
topology: tpu7x:2x2x1
jax: 0.10.0
libtpu: 0.0.40
codegen_flags: <defaults>
</compile_context>

<pallas_src>
import numpy as np

import jax
import jax.numpy as jnp
from jax.experimental import pallas as pl
from jax.experimental.pallas import tpu as pltpu


def _round_up(n, m):
    return ((n + m - 1) // m) * m


def _mlp_kernel(x_ref, w1_ref, b1_ref, w2_ref, b2_ref, w3_ref, b3_ref, o_ref):
    """One batch tile: x_ref (3, TB) -> o_ref (10, TB), batch on the lane axis."""
    cd = x_ref.dtype  # MXU operand dtype (f32 by default, bf16 if bf16 input)
    x = x_ref[...]

    # fc1 + ReLU : (16, 3) @ (3, TB) -> (16, TB), f32 accumulation.
    h1 = jnp.dot(w1_ref[...], x, preferred_element_type=jnp.float32) + b1_ref[...]
    h1 = jnp.maximum(h1, 0.0).astype(cd)

    # fc2 + ReLU : (32, 16) @ (16, TB) -> (32, TB)
    h2 = jnp.dot(w2_ref[...], h1, preferred_element_type=jnp.float32) + b2_ref[...]
    h2 = jnp.maximum(h2, 0.0).astype(cd)

    # fc3 : (10, 32) @ (32, TB) -> (10, TB)
    out = jnp.dot(w3_ref[...], h2, preferred_element_type=jnp.float32) + b3_ref[...]
    o_ref[...] = out.astype(o_ref.dtype)


def color_classifier_forward_fm(x_fm, params, *, max_tile_b=32768, out_dtype=None):
    """Feature-major forward: x_fm (3, B) -> (10, B). No layout plumbing."""
    f_in, batch = x_fm.shape
    assert f_in == 3, f"expected (3, B) feature-major input, got {x_fm.shape}"
    if out_dtype is None:
        out_dtype = x_fm.dtype
    cd = x_fm.dtype

    # Cast weights once outside the kernel (operand dtype); biases stay f32.
    w1 = params["w1"].astype(cd)
    w2 = params["w2"].astype(cd)
    w3 = params["w3"].astype(cd)
    b1 = params["b1"].astype(jnp.float32)
    b2 = params["b2"].astype(jnp.float32)
    b3 = params["b3"].astype(jnp.float32)

    # Tile sizing: big tiles amortize per-step overhead, but keep >= 2 grid
    # steps (v7x megacore) and a multiple of 128 lanes.  A batch that fits in a
    # single block uses the full (un-padded) array extent instead.
    max_tile_b = max(128, _round_up(int(max_tile_b), 128))
    tile_b = min(max_tile_b, max(128, _round_up(pl.cdiv(batch, 2), 128)))
    n_tiles = pl.cdiv(batch, tile_b)
    if n_tiles == 1:
        tile_b = batch  # block == full array dims (exempt from the 128-lane rule)

    itemsize = x_fm.dtype.itemsize
    out_itemsize = np.dtype(out_dtype).itemsize
    per_lane_bytes = (
        2 * 3 * itemsize                 # double-buffered x tile
        + 2 * 10 * out_itemsize          # double-buffered out tile
        + (16 + 32) * (4 + itemsize)     # h1/h2 f32 accumulators + operand copies
    )
    vmem_limit = int(min(48 << 20, max(32 << 20, per_lane_bytes * tile_b + (2 << 20))))

    cost = pl.CostEstimate(
        flops=2 * batch * (3 * 16 + 16 * 32 + 32 * 10),
        transcendentals=0,
        bytes_accessed=(
            3 * batch * itemsize
            + 10 * batch * out_itemsize
            + sum(int(a.size) * a.dtype.itemsize for a in (w1, b1, w2, b2, w3, b3))
        ),
    )

    resident = lambda a: pl.BlockSpec(a.shape, lambda i: (0, 0))

    return pl.pallas_call(
        _mlp_kernel,
        out_shape=jax.ShapeDtypeStruct((10, batch), out_dtype),
        grid=(n_tiles,),
        in_specs=[
            pl.BlockSpec((3, tile_b), lambda i: (0, i)),   # x tile (pipelined)
            resident(w1), resident(b1),
            resident(w2), resident(b2),
            resident(w3), resident(b3),
        ],
        out_specs=pl.BlockSpec((10, tile_b), lambda i: (0, i)),
        compiler_params=pltpu.CompilerParams(
            dimension_semantics=("parallel",),   # shard batch tiles across TCs (v7x)
            vmem_limit_bytes=vmem_limit,
        ),
        cost_estimate=cost,
    )(x_fm, w1, b1, w2, b2, w3, b3)


def color_classifier_forward(x, params, **kwargs):
    """(B, 3) -> (B, 10) convenience wrapper.

    The two transposes here are wrapper-side layout plumbing; large-B hot paths
    should call `color_classifier_forward_fm` directly (or fuse the transposes
    into the adjacent producer/consumer ops).
    """
    return color_classifier_forward_fm(x.T, params, **kwargs).T


def init_params(key):
    """Deterministic init matching nn.Linear: w (out, in), b (out, 1)."""
    keys = jax.random.split(key, 6)

    def linear(kw, kb, fan_in, fan_out):
        bound = float(fan_in) ** -0.5
        w = jax.random.uniform(kw, (fan_out, fan_in), jnp.float32, -bound, bound)
        b = jax.random.uniform(kb, (fan_out, 1), jnp.float32, -bound, bound)
        return w, b

    w1, b1 = linear(keys[0], keys[1], 3, 16)
    w2, b2 = linear(keys[2], keys[3], 16, 32)
    w3, b3 = linear(keys[4], keys[5], 32, 10)
    return {"w1": w1, "b1": b1, "w2": w2, "b2": b2, "w3": w3, "b3": b3}


def reference_forward(x, p):
    h1 = jnp.maximum(x @ p["w1"].T + p["b1"].T, 0.0)
    h2 = jnp.maximum(h1 @ p["w2"].T + p["b2"].T, 0.0)
    return h2 @ p["w3"].T + p["b3"].T


if __name__ == "__main__":
    key = jax.random.PRNGKey(0)
    k_x, k_p = jax.random.split(key)
    params = init_params(k_p)

    # 1) Small batch through the (B, 3) convenience wrapper: a single
    #    full-extent block (lane dim == B, exempt from the 128-lane rule).
    B = 8
    x = jax.random.normal(k_x, (B, 3), dtype=jnp.float32)
    out = jax.block_until_ready(color_classifier_forward(x, params))
    ref = reference_forward(x, params)
    assert out.shape == (B, 10)
    assert jnp.allclose(out, ref, atol=1e-5, rtol=1e-5)

    # 2) Feature-major hot path: multi-step grid (256 + ragged 44 lanes) so the
    #    "parallel" batch axis has >= 2 steps to shard across v7x's TensorCores,
    #    and the ragged last block exercises Pallas OOB masking (no host pad).
    B2 = 300
    x2 = jax.random.normal(k_x, (B2, 3), dtype=jnp.float32)
    out2 = jax.block_until_ready(color_classifier_forward_fm(x2.T, params))
    ref2 = reference_forward(x2, params)
    assert out2.shape == (10, B2)
    assert jnp.allclose(out2.T, ref2, atol=1e-5, rtol=1e-5)

    # 3) bf16 *output* only (inputs/compute stay f32): halves output HBM
    #    traffic without quantizing the inputs.
    out3 = jax.block_until_ready(
        color_classifier_forward(x, params, out_dtype=jnp.bfloat16))
    assert out3.dtype == jnp.bfloat16
    assert jnp.allclose(out3.astype(jnp.float32), ref, atol=2e-2, rtol=2e-2)

    print("KERNEL_OK")
</pallas_src>

<mosaic_0001>
module attributes {stable_mosaic.version = 11 : i64} {
  func.func @_mlp_kernel(%arg0: i32, %arg1: memref<3x8xf32, #tpu.memory_space<vmem>>, %arg2: memref<16x3xf32, #tpu.memory_space<vmem>>, %arg3: memref<16x1xf32, #tpu.memory_space<vmem>>, %arg4: memref<32x16xf32, #tpu.memory_space<vmem>>, %arg5: memref<32x1xf32, #tpu.memory_space<vmem>>, %arg6: memref<10x32xf32, #tpu.memory_space<vmem>>, %arg7: memref<10x1xf32, #tpu.memory_space<vmem>>, %arg8: memref<10x8xf32, #tpu.memory_space<vmem>>) attributes {dimension_semantics = [#tpu.dimension_semantics<parallel>], iteration_bounds = array<i64: 1>, scalar_prefetch = 0 : i64, scratch_operands = 0 : i64, tpu.core_type = #tpu.core_type<tc>, window_params = [{transform_indices = @transform_0, window_bounds = array<i64: 3, 8>}, {pipeline_mode = #tpu.pipeline_mode<synchronous>, transform_indices = @transform_1, window_bounds = array<i64: 16, 3>}, {pipeline_mode = #tpu.pipeline_mode<synchronous>, transform_indices = @transform_2, window_bounds = array<i64: 16, 1>}, {pipeline_mode = #tpu.pipeline_mode<synchronous>, transform_indices = @transform_3, window_bounds = array<i64: 32, 16>}, {pipeline_mode = #tpu.pipeline_mode<synchronous>, transform_indices = @transform_4, window_bounds = array<i64: 32, 1>}, {pipeline_mode = #tpu.pipeline_mode<synchronous>, transform_indices = @transform_5, window_bounds = array<i64: 10, 32>}, {pipeline_mode = #tpu.pipeline_mode<synchronous>, transform_indices = @transform_6, window_bounds = array<i64: 10, 1>}, {transform_indices = @transform_7, window_bounds = array<i64: 10, 8>}]} {
    %c0 = arith.constant 0 : index
    %c0_0 = arith.constant 0 : index
    %0 = vector.load %arg1[%c0, %c0_0] : memref<3x8xf32, #tpu.memory_space<vmem>>, vector<3x8xf32>
    %c0_1 = arith.constant 0 : index
    %c0_2 = arith.constant 0 : index
    %1 = vector.load %arg2[%c0_1, %c0_2] : memref<16x3xf32, #tpu.memory_space<vmem>>, vector<16x3xf32>
    %cst = arith.constant dense<0.000000e+00> : vector<16x8xf32>
    %2 = tpu.matmul %1, %0, %cst {dimension_numbers = #tpu.dot_dimension_numbers<[1], [0], [0], [1], [0, 0, 1, 1], [], []>} : vector<16x3xf32>, vector<3x8xf32>, vector<16x8xf32> -> vector<16x8xf32>
    %c0_3 = arith.constant 0 : index
    %c0_4 = arith.constant 0 : index
    %3 = vector.load %arg3[%c0_3, %c0_4] : memref<16x1xf32, #tpu.memory_space<vmem>>, vector<16x1xf32>
    %4 = vector.broadcast %3 : vector<16x1xf32> to vector<16x8xf32>
    %5 = arith.addf %2, %4 : vector<16x8xf32>
    %cst_5 = arith.constant 0.000000e+00 : f32
    %6 = vector.broadcast %cst_5 : f32 to vector<16x8xf32>
    %7 = arith.maximumf %5, %6 : vector<16x8xf32>
    %c0_6 = arith.constant 0 : index
    %c0_7 = arith.constant 0 : index
    %8 = vector.load %arg4[%c0_6, %c0_7] : memref<32x16xf32, #tpu.memory_space<vmem>>, vector<32x16xf32>
    %cst_8 = arith.constant dense<0.000000e+00> : vector<32x8xf32>
    %9 = tpu.matmul %8, %7, %cst_8 {dimension_numbers = #tpu.dot_dimension_numbers<[1], [0], [0], [1], [0, 0, 1, 1], [], []>} : vector<32x16xf32>, vector<16x8xf32>, vector<32x8xf32> -> vector<32x8xf32>
    %c0_9 = arith.constant 0 : index
    %c0_10 = arith.constant 0 : index
    %10 = vector.load %arg5[%c0_9, %c0_10] : memref<32x1xf32, #tpu.memory_space<vmem>>, vector<32x1xf32>
    %11 = vector.broadcast %10 : vector<32x1xf32> to vector<32x8xf32>
    %12 = arith.addf %9, %11 : vector<32x8xf32>
    %cst_11 = arith.constant 0.000000e+00 : f32
    %13 = vector.broadcast %cst_11 : f32 to vector<32x8xf32>
    %14 = arith.maximumf %12, %13 : vector<32x8xf32>
    %c0_12 = arith.constant 0 : index
    %c0_13 = arith.constant 0 : index
    %15 = vector.load %arg6[%c0_12, %c0_13] : memref<10x32xf32, #tpu.memory_space<vmem>>, vector<10x32xf32>
    %cst_14 = arith.constant dense<0.000000e+00> : vector<10x8xf32>
    %16 = tpu.matmul %15, %14, %cst_14 {dimension_numbers = #tpu.dot_dimension_numbers<[1], [0], [0], [1], [0, 0, 1, 1], [], []>} : vector<10x32xf32>, vector<32x8xf32>, vector<10x8xf32> -> vector<10x8xf32>
    %c0_15 = arith.constant 0 : index
    %c0_16 = arith.constant 0 : index
    %17 = vector.load %arg7[%c0_15, %c0_16] : memref<10x1xf32, #tpu.memory_space<vmem>>, vector<10x1xf32>
    %18 = vector.broadcast %17 : vector<10x1xf32> to vector<10x8xf32>
    %19 = arith.addf %16, %18 : vector<10x8xf32>
    %c0_17 = arith.constant 0 : index
    %c0_18 = arith.constant 0 : index
    %20 = vector.load %arg8[%c0_17, %c0_18] : memref<10x8xf32, #tpu.memory_space<vmem>>, vector<10x8xf32>
    tpu.vector_store %arg8[%c0_17, %c0_18], %19 {strides = array<i32>} : memref<10x8xf32, #tpu.memory_space<vmem>>, vector<10x8xf32>,
    return
  }
  func.func @transform_0(%arg0: i32) -> (i32, i32) {
    %c0_i32 = arith.constant 0 : i32
    %c0_i32_0 = arith.constant 0 : i32
    return %c0_i32, %arg0 : i32, i32
  }
  func.func @transform_1(%arg0: i32) -> (i32, i32) {
    %c0_i32 = arith.constant 0 : i32
    %c0_i32_0 = arith.constant 0 : i32
    %c0_i32_1 = arith.constant 0 : i32
    return %c0_i32, %c0_i32_0 : i32, i32
  }
  func.func @transform_2(%arg0: i32) -> (i32, i32) {
    %c0_i32 = arith.constant 0 : i32
    %c0_i32_0 = arith.constant 0 : i32
    %c0_i32_1 = arith.constant 0 : i32
    return %c0_i32, %c0_i32_0 : i32, i32
  }
  func.func @transform_3(%arg0: i32) -> (i32, i32) {
    %c0_i32 = arith.constant 0 : i32
    %c0_i32_0 = arith.constant 0 : i32
    %c0_i32_1 = arith.constant 0 : i32
    return %c0_i32, %c0_i32_0 : i32, i32
  }
  func.func @transform_4(%arg0: i32) -> (i32, i32) {
    %c0_i32 = arith.constant 0 : i32
    %c0_i32_0 = arith.constant 0 : i32
    %c0_i32_1 = arith.constant 0 : i32
    return %c0_i32, %c0_i32_0 : i32, i32
  }
  func.func @transform_5(%arg0: i32) -> (i32, i32) {
    %c0_i32 = arith.constant 0 : i32
    %c0_i32_0 = arith.constant 0 : i32
    %c0_i32_1 = arith.constant 0 : i32
    return %c0_i32, %c0_i32_0 : i32, i32
  }
  func.func @transform_6(%arg0: i32) -> (i32, i32) {
    %c0_i32 = arith.constant 0 : i32
    %c0_i32_0 = arith.constant 0 : i32
    %c0_i32_1 = arith.constant 0 : i32
    return %c0_i32, %c0_i32_0 : i32, i32
  }
  func.func @transform_7(%arg0: i32) -> (i32, i32) {
    %c0_i32 = arith.constant 0 : i32
    %c0_i32_0 = arith.constant 0 : i32
    return %c0_i32, %arg0 : i32, i32
  }
}

</mosaic_0001>

<bundles_post_ra>
// kernel: tpu_custom_call.1
= control target key start
LH: loop header
LB: loop body
LE: loop exit
PB: predicated region body
PF: predicated region fallthrough
CT: control target
= control target key end

     0   :  { %vm48_vm0 = vcmask 1042432   ;;  %vm41_vm1 = vcmask 23552   ;;  %v428_v3 = vmov 0   ;;  %vm157_vm2 = vcmask 130048   ;;  %s532_s0 = inlined_call_operand.vmem [shape: f32[3,8], index: 0, kind: input, shape index: {}]   ;;  %s533_s1 = inlined_call_operand.vmem [shape: f32[16,3], index: 1, kind: input, shape index: {}]   ;;  %s534_s2 = inlined_call_operand.vmem [shape: f32[16,1], index: 2, kind: input, shape index: {}]   ;;  %s535_s4 = inlined_call_operand.vmem [shape: f32[32,1], index: 4, kind: input, shape index: {}]   ;;  %s536_s6 = inlined_call_operand.vmem [shape: f32[10,1], index: 6, kind: input, shape index: {}]   ;;  %s537_s3 = inlined_call_operand.vmem [shape: f32[32,16], index: 3, kind: input, shape index: {}]   ;;  %s538_s5 = inlined_call_operand.vmem [shape: f32[10,32], index: 5, kind: input, shape index: {}]   ;;  %s539_s7 = inlined_call_operand.vmem [shape: f32[10,8], index: 7, kind: output, shape index: {}]  }
   0x1   :  { %v26_v0 = vld [vmem:[%s532_s0] sm:$0x7]  ;;  %v28_v2 = vld [vmem:[%s533_s1 + $0x8] sm:$0xff]  ;;  %426 = vset.pattern.permute.xlu0 %v428_v3  ;;  %427 = vset.pattern.permute.xlu1 %v428_v3  ;;  %v135_v6 = vld [vmem:[%s535_s4 + $0x10] sm:$0xff]  ;;  %vm273_vm3 = vcmask 261120   ;;  %vm357_vm4 = vcmask 58368  }
   0x2   :  { %v27_v1 = vld [vmem:[%s533_s1] sm:$0xff]  ;;  %387 = vmatprep.subr.msk.mxu0 %vm48_vm0, %v26_v0  ;;  %v30_v5 = vld [vmem:[%s534_s2 + $0x8] sm:$0xff]  ;;  %v136_v11 = vld [vmem:[%s535_s4 + $0x18] sm:$0xff]  ;;  %vm355_vm5 = vcmask 64512  }
   0x3   :  { %389 = vmatprep.mubr.msk.f32.mxu0 %vm41_vm1, %v27_v1  ;;  %v29_v4 = vld [vmem:[%s534_s2] sm:$0xff]  ;;  %388 = vmatpush3.msk.msra.mxu0 %vm48_vm0, %v26_v0  ;;  %v134_v10 = vld [vmem:[%s535_s4 + $0x8] sm:$0xff]  ;;  %v131_v23 = vld [vmem:[%s537_s3 + $0x10] sm:$0xff] }
   0x4   :  { %33 = vperm.xlu0 %426, %v29_v4   ;;  %390 = vmatmul.mubr.msk.f32.vlgmr.msra.gmra.mrb[0].mxu0 %vm41_vm1, %v28_v2  ;;  %v261_v7 = vld [vmem:[%s536_s6] sm:$0xff]  ;;  %v262_v12 = vld [vmem:[%s536_s6 + $0x8] sm:$0x3]  ;;  %v132_v24 = vld [vmem:[%s537_s3 + $0x18] sm:$0xff] }
   0x5   :  { %v129_v8 = vld [vmem:[%s537_s3] sm:$0xff]  ;;  %v130_v22 = vld [vmem:[%s537_s3 + $0x8] sm:$0xff] }
   0x6   :  { %396 = vmatprep.mubr.msk.f32.mxu1 %vm157_vm2, %v129_v8  ;;  %v133_v9 = vld [vmem:[%s535_s4] sm:$0xff]  ;;  %v260_v44 = vld [vmem:[%s538_s5 + $0x8] sm:$0x3] }
   0x7   :  { %139 = vperm.xlu1 %427, %v133_v9   ;;  %v259_v25 = vld [vmem:[%s538_s5] sm:$0xff] }
   0x8   :  { %38 = vperm.xlu0 %426, %v30_v5   ;;  %410 = vmatprep.mubr.msk.f32.mxu0 %vm273_vm3, %v259_v25 }
   0xb   :  { %144 = vperm.xlu1 %427, %v134_v10  }
   0xc   :  { %149 = vperm.xlu0 %426, %v135_v6  }
   0xf   :  { %154 = vperm.xlu1 %427, %v136_v11  }
  0x10   :  { %265 = vperm.xlu0 %426, %v261_v7  }
  0x13   :  { %270 = vperm.xlu1 %427, %v262_v12  }
  0x83   :  { %v34_v13 = vpop.permute.xlu0 %33 }
  0x86   :  { %v140_v26 = vpop.permute.xlu1 %139 }
  0x87   :  { %v39_v14 = vpop.permute.xlu0 %38 }
  0x8a   :  { %v145_v27 = vpop.permute.xlu1 %144 }
  0x8b   :  { %v150_v36 = vpop.permute.xlu0 %149 }
  0x8e   :  { %v155_v33 = vpop.permute.xlu1 %154 }
  0x8f   :  { %v266_v47 = vpop.permute.xlu0 %265 }
  0x92   :  { %v271_v45 = vpop.permute.xlu1 %270 }
  0xd7   :  { %v391_v15 = vpop.f32.mrb[0].mxu0 }
  0xd8   :  { %v124_v16 = vadd.f32 %v391_v15, %v39_v14  ;;  %v118_v17 = vpop.f32.mrb[1].mxu0 }
  0xd9   :  { %v119_v18 = vadd.f32 %v118_v17, %v34_v13 }
  0xda   :  { %v128_v19 = vmax.f32 %v124_v16, 0.0 }
  0xdb   :  { %v127_v20 = vmax.f32 %v119_v18, 0.0 }
  0xdd   :  { %v413_v21 = vpack.c.bf16 %v128_v19, %v127_v20 }
  0xdf   :  { %414 = vmatprep.subr.bf16.mxu1 %v413_v21 }
  0xe0   :  { %416 = vmatpush3.bf16.msra.mxu1 %v413_v21 }
  0xe3   :  { %397 = vmatmul.mubr.msk.f32.vlgmr.msra.gmra.mrb[0].mxu1 %vm157_vm2, %v130_v22 }
  0xe4   :  { %399 = vmatprep.mubr.msk.f32.mxu1 %vm157_vm2, %v131_v23 }
  0xe7   :  { %400 = vmatmul.mubr.msk.f32.gmra.mrb[2].mxu1 %vm157_vm2, %v132_v24 }
 0x1b6   :  { %v398_v28 = vpop.f32.mrb[0].mxu1 }
 0x1b7   :  { %v242_v29 = vadd.f32 %v398_v28, %v145_v27  ;;  %v236_v30 = vpop.f32.mrb[1].mxu1 }
 0x1b8   :  { %v237_v31 = vadd.f32 %v236_v30, %v140_v26 }
 0x1b9   :  { %v256_v32 = vmax.f32 %v242_v29, 0.0 }
 0x1ba   :  { %v255_v34 = vmax.f32 %v237_v31, 0.0  ;;  %v401_v35 = vpop.f32.mrb[2].mxu1 }
 0x1bb   :  { %v252_v37 = vadd.f32 %v401_v35, %v155_v33  ;;  %v246_v38 = vpop.f32.mrb[3].mxu1 }
 0x1bc   :  { %v417_v39 = vpack.c.bf16 %v256_v32, %v255_v34  ;;  %v247_v40 = vadd.f32 %v246_v38, %v150_v36 }
 0x1bd   :  { %v258_v41 = vmax.f32 %v252_v37, 0.0 }
 0x1be   :  { %v257_v42 = vmax.f32 %v247_v40, 0.0  ;;  %418 = vmatprep.subr.bf16.mxu0 %v417_v39 }
 0x1bf   :  { %420 = vmatpush3.bf16.msra.mxu0 %v417_v39 }
 0x1c0   :  { %v421_v43 = vpack.c.bf16 %v258_v41, %v257_v42 }
 0x1c2   :  { %422 = vmatprep.subr.bf16.mxu0 %v421_v43 }
 0x1c3   :  { %424 = vmatpush3.bf16.msra.mxu0 %v421_v43 }
 0x1c6   :  { %411 = vmatmul.mubr.msk.f32.vlgmr.msra.gmra.mrb[2].mxu0 %vm273_vm3, %v260_v44 }
 0x299   :  { %v412_v46 = vpop.f32.mrb[2].mxu0 }
 0x29a   :  { %v352_v48 = vadd.f32 %v412_v46, %v271_v45  ;;  %v346_v49 = vpop.f32.mrb[3].mxu0 }
 0x29b   :  { %v347_v50 = vadd.f32 %v346_v49, %v266_v47 }
 0x29c   :  { %358 = vst.msk [vmem:[%s539_s7 + $0x8] sm:$0x3] %vm357_vm4, %v352_v48 }
 0x29d   :  { %356 = vst.msk [vmem:[%s539_s7] sm:$0xff] %vm355_vm5, %v347_v50 }

</bundles_post_ra>
